<compile_context>
chip_gen: v6e
topology: v6e:2x2x1
jax: 0.10.0
libtpu: 0.0.40
codegen_flags: <defaults>
</compile_context>

<pallas_src>
import functools

import jax
import jax.numpy as jnp
from jax import lax
from jax.experimental import pallas as pl
from jax.experimental.pallas import tpu as pltpu


def _round_up(x, m):
    return (x + m - 1) // m * m


# -----------------------------------------------------------------------------
# Output projection kernel:  out = A @ W + b, tiled over rows of A.
#   A : (M, Hp)  hidden states (M = L * Bp)
#   W : (Hp, V)  projection weights (zero rows for padded hidden lanes)
#   b : (1, V)
# The output last dim is V directly (trim happens in the store), so the
# wrapper never re-slices the largest tensor.
# -----------------------------------------------------------------------------
def _matmul_bias_kernel(a_ref, w_ref, b_ref, o_ref, *, compute_dtype):
    a = a_ref[...].astype(compute_dtype)
    w = w_ref[...].astype(compute_dtype)
    o_ref[...] = (jnp.dot(a, w, preferred_element_type=jnp.float32)
                  + b_ref[...])


def matmul_bias(a, w, b, *, compute_dtype=jnp.float32, tile_m=256):
    M, K = a.shape
    K2, N = w.shape
    assert K == K2 and b.shape == (1, N)
    tm = min(tile_m, M)                      # M is always a multiple of 8
    grid_m = pl.cdiv(M, tm)                  # partial last tile handled by Pallas
    kernel = functools.partial(_matmul_bias_kernel, compute_dtype=compute_dtype)
    return pl.pallas_call(
        kernel,
        out_shape=jax.ShapeDtypeStruct((M, N), jnp.float32),
        grid_spec=pltpu.PrefetchScalarGridSpec(
            num_scalar_prefetch=0,
            grid=(grid_m,),
            in_specs=[pl.BlockSpec((tm, K), lambda i: (i, 0)),
                      pl.BlockSpec((K, N), lambda i: (0, 0)),
                      pl.BlockSpec((1, N), lambda i: (0, 0))],
            out_specs=pl.BlockSpec((tm, N), lambda i: (i, 0)),
        ),
        compiler_params=pltpu.CompilerParams(
            dimension_semantics=("parallel",)),   # v7x: split rows across TCs
    )(a, w, b)


# -----------------------------------------------------------------------------
# Streamed LSTM recurrence: grid=(L,), one timestep per grid iteration.
#   z    : (L, Bp, 4*Hp)  precomputed gate pre-activations (gathered table)
#   h0,c0: (Bp, Hp)       initial state (zero-padded)
#   whh  : (Hp, 4*Hp)     recurrent weights (gate-block padded, zero rows/cols)
# Outputs: h_all (L, Bp, Hp), h_n (Bp, Hp), c_n (Bp, Hp)
# Carry lives in VMEM scratch; only the h @ W_hh matmul + gate math is serial.
# -----------------------------------------------------------------------------
def _lstm_step_kernel(z_ref, h0_ref, c0_ref, whh_ref,
                      hall_ref, hn_ref, cn_ref, h_sc, c_sc):
    Hp = h_sc.shape[-1]
    t = pl.program_id(0)

    @pl.when(t == 0)
    def _():
        h_sc[...] = h0_ref[...]
        c_sc[...] = c0_ref[...]

    h = h_sc[...]
    c = c_sc[...]
    # Only the recurrent matmul remains on the serial path.
    # TODO(synk): optional bf16 cast of h/whh here would ~halve the per-step
    # MXU latency if acceptable numerically (kept f32 to match PyTorch).
    gates = z_ref[0] + jnp.dot(h, whh_ref[...],
                               preferred_element_type=jnp.float32)
    # Gate slices are full 128-lane-aligned chunks (Hp is a multiple of 128).
    i_g = jax.nn.sigmoid(gates[:, 0 * Hp:1 * Hp])
    f_g = jax.nn.sigmoid(gates[:, 1 * Hp:2 * Hp])
    g_g = jnp.tanh(gates[:, 2 * Hp:3 * Hp])
    o_g = jax.nn.sigmoid(gates[:, 3 * Hp:4 * Hp])
    c_new = f_g * c + i_g * g_g
    h_new = o_g * jnp.tanh(c_new)

    h_sc[...] = h_new
    c_sc[...] = c_new
    hall_ref[0] = h_new                      # full (8,128)-aligned vreg store

    @pl.when(t == pl.num_programs(0) - 1)
    def _():
        hn_ref[...] = h_new                  # final state written exactly once
        cn_ref[...] = c_new


def lstm_recurrence(z, h0, c0, whh):
    L, Bp, G = z.shape
    Hp = h0.shape[-1]
    # TODO(synk): for large production batches on v7x, add a leading parallel
    # batch-grid axis (or pl.core_map) to split the recurrence across the two
    # TensorCores; no effect on single-TC v5e/v6e.
    return pl.pallas_call(
        _lstm_step_kernel,
        out_shape=(jax.ShapeDtypeStruct((L, Bp, Hp), jnp.float32),
                   jax.ShapeDtypeStruct((Bp, Hp), jnp.float32),
                   jax.ShapeDtypeStruct((Bp, Hp), jnp.float32)),
        grid_spec=pltpu.PrefetchScalarGridSpec(
            num_scalar_prefetch=0,
            grid=(L,),
            in_specs=[pl.BlockSpec((1, Bp, G), lambda t: (t, 0, 0)),
                      pl.BlockSpec((Bp, Hp), lambda t: (0, 0)),
                      pl.BlockSpec((Bp, Hp), lambda t: (0, 0)),
                      pl.BlockSpec((Hp, G), lambda t: (0, 0))],
            out_specs=[pl.BlockSpec((1, Bp, Hp), lambda t: (t, 0, 0)),
                       pl.BlockSpec((Bp, Hp), lambda t: (0, 0)),
                       pl.BlockSpec((Bp, Hp), lambda t: (0, 0))],
            scratch_shapes=[pltpu.VMEM((Bp, Hp), jnp.float32),   # h carry
                            pltpu.VMEM((Bp, Hp), jnp.float32)],  # c carry
        ),
        compiler_params=pltpu.CompilerParams(
            dimension_semantics=("arbitrary",)),   # serial carry over time
    )(z, h0, c0, whh)


# -----------------------------------------------------------------------------
# Wrapper: CharDecoder.forward
# -----------------------------------------------------------------------------
def char_decoder_forward(input_ids, params, dec_hidden=None,
                         use_bf16_matmul=False):
    """Pallas equivalent of CharDecoder.forward.

    input_ids : (L, B) int32
    params    : dict of raw PyTorch-convention parameters (see make_params)
    returns   : scores (L, B, V), (h_n, c_n) each (1, B, H)

    use_bf16_matmul=True runs the bulk output projection in bf16 (f32
    accumulation).  This roughly doubles MXU throughput on v5e/v6e/v7x but
    will not match the f32 PyTorch reference to 1e-5 (use looser tolerances).
    """
    emb = params["emb"]                                  # (V, E), pad row = 0
    w_ih, w_hh = params["w_ih"], params["w_hh"]          # (4H, E), (4H, H)
    bias = params["b_ih"] + params["b_hh"]               # (4H,)
    w_proj, b_proj = params["w_proj"], params["b_proj"]  # (V, H), (V,)

    L, B = input_ids.shape
    V, E = emb.shape
    H = w_hh.shape[1]
    Hp = _round_up(max(H, 1), 128)     # gate-aligned hidden padding
    Bp = _round_up(max(B, 1), 8)       # sublane-aligned batch padding
    # TODO(synk): for tiny H (<< 128) a lane-packed gate layout would cut the
    # 4x zero-column overhead in Z / whh / h_all; Hp padding kept for clarity.

    if dec_hidden is None:
        h0 = jnp.zeros((B, H), jnp.float32)
        c0 = jnp.zeros((B, H), jnp.float32)
    else:
        h0 = dec_hidden[0].reshape(B, H).astype(jnp.float32)
        c0 = dec_hidden[1].reshape(B, H).astype(jnp.float32)

    if L == 0:  # degenerate: no timesteps -> state unchanged, empty scores
        return jnp.zeros((0, B, V), jnp.float32), (h0[None], c0[None])

    # ---- parameter padding / table construction (trace-time, tiny) ----------
    def pad_gate_cols(w_t):             # (rows, 4H) -> (rows, 4*Hp), zero pad
        rows = w_t.shape[0]
        out = jnp.zeros((rows, 4 * Hp), jnp.float32)
        for k in range(4):              # PyTorch LSTM gate order: i, f, g, o
            out = out.at[:, k * Hp:k * Hp + H].set(w_t[:, k * H:(k + 1) * H])
        return out

    # Input projection folded into the embedding table:
    #   Z[t, b] = emb[id] @ W_ih^T + (b_ih + b_hh) == zt_table[id]
    zt_table = pad_gate_cols(
        emb.astype(jnp.float32) @ w_ih.T.astype(jnp.float32)
        + bias[None, :].astype(jnp.float32))                     # (V, 4*Hp)

    whh_p = (jnp.zeros((Hp, 4 * Hp), jnp.float32)
             .at[:H].set(pad_gate_cols(w_hh.T.astype(jnp.float32))))
    wproj_p = (jnp.zeros((Hp, V), jnp.float32)
               .at[:H, :].set(w_proj.T.astype(jnp.float32)))     # (Hp, V)
    bproj = b_proj.astype(jnp.float32)[None, :]                  # (1, V)

    h0_p = jnp.zeros((Bp, Hp), jnp.float32).at[:B, :H].set(h0)
    c0_p = jnp.zeros((Bp, Hp), jnp.float32).at[:B, :H].set(c0)
    ids_p = jnp.zeros((L, Bp), jnp.int32).at[:, :B].set(
        input_ids.astype(jnp.int32))

    # ---- gate pre-activations via gather (replaces the input-proj matmul) ---
    z = jnp.take(zt_table, ids_p, axis=0)                        # (L, Bp, 4*Hp)

    # ---- streamed serial LSTM recurrence (grid over timesteps) --------------
    h_all, hn_p, cn_p = lstm_recurrence(z, h0_p, c0_p, whh_p)

    # ---- tiled bulk output projection: scores = H_all @ W_proj^T + b --------
    mm_dtype = jnp.bfloat16 if use_bf16_matmul else jnp.float32
    s2d = matmul_bias(h_all.reshape(L * Bp, Hp), wproj_p, bproj,
                      compute_dtype=mm_dtype)                    # (L*Bp, V)
    scores = s2d.reshape(L, Bp, V)[:, :B, :]

    h_n = hn_p[:B, :H]
    c_n = cn_p[:B, :H]
    return scores, (h_n[None], c_n[None])


# -----------------------------------------------------------------------------
# Parameters (PyTorch convention) and pure-JAX reference
# -----------------------------------------------------------------------------
def make_params(key, vocab_size, char_embedding_size, hidden_size, pad_idx=0):
    ks = jax.random.split(key, 7)
    E, H, V = char_embedding_size, hidden_size, vocab_size
    emb = 0.1 * jax.random.normal(ks[0], (V, E), jnp.float32)
    emb = emb.at[pad_idx].set(0.0)      # nn.Embedding(padding_idx=pad) row = 0
    return dict(
        emb=emb,
        w_ih=0.1 * jax.random.normal(ks[1], (4 * H, E), jnp.float32),
        w_hh=0.1 * jax.random.normal(ks[2], (4 * H, H), jnp.float32),
        b_ih=0.1 * jax.random.normal(ks[3], (4 * H,), jnp.float32),
        b_hh=0.1 * jax.random.normal(ks[4], (4 * H,), jnp.float32),
        w_proj=0.1 * jax.random.normal(ks[5], (V, H), jnp.float32),
        b_proj=0.1 * jax.random.normal(ks[6], (V,), jnp.float32),
    )


def reference_forward(input_ids, params, dec_hidden=None):
    """Pure-JAX reference (lax.scan LSTM) for correctness checking."""
    emb = params["emb"]
    w_ih, w_hh = params["w_ih"], params["w_hh"]
    bias = params["b_ih"] + params["b_hh"]
    w_proj, b_proj = params["w_proj"], params["b_proj"]
    H = w_hh.shape[1]
    L, B = input_ids.shape
    x = jnp.take(emb, input_ids, axis=0)
    if dec_hidden is None:
        h0 = jnp.zeros((B, H), jnp.float32)
        c0 = jnp.zeros((B, H), jnp.float32)
    else:
        h0, c0 = dec_hidden[0][0], dec_hidden[1][0]

    def step(carry, xt):
        h, c = carry
        gates = xt @ w_ih.T + h @ w_hh.T + bias
        i = jax.nn.sigmoid(gates[:, :H])
        f = jax.nn.sigmoid(gates[:, H:2 * H])
        g = jnp.tanh(gates[:, 2 * H:3 * H])
        o = jax.nn.sigmoid(gates[:, 3 * H:])
        c = f * c + i * g
        h = o * jnp.tanh(c)
        return (h, c), h

    (h_n, c_n), hs = lax.scan(step, (h0, c0), x)
    scores = hs @ w_proj.T + b_proj
    return scores, (h_n[None], c_n[None])


if __name__ == "__main__":
    # Small shapes consistent with the module: seq=8, batch=4,
    # char_embedding_size=32, hidden_size=32, vocab=64.
    L, B, E, H, V = 8, 4, 32, 32, 64
    PAD = 0

    key = jax.random.PRNGKey(0)
    k_par, k_inp, k_h, k_c = jax.random.split(key, 4)

    params = make_params(k_par, vocab_size=V, char_embedding_size=E,
                         hidden_size=H, pad_idx=PAD)
    input_ids = jax.random.randint(k_inp, (L, B), 0, V, dtype=jnp.int32)
    dec_hidden = (0.1 * jax.random.normal(k_h, (1, B, H), jnp.float32),
                  0.1 * jax.random.normal(k_c, (1, B, H), jnp.float32))

    fwd = jax.jit(char_decoder_forward, static_argnames=("use_bf16_matmul",))

    # ---- f32 path: must match the PyTorch-semantics reference tightly -------
    scores, (h_n, c_n) = fwd(input_ids, params, dec_hidden)
    jax.block_until_ready((scores, h_n, c_n))

    scores_ref, (h_ref, c_ref) = reference_forward(input_ids, params, dec_hidden)
    assert scores.shape == (L, B, V)
    assert h_n.shape == (1, B, H) and c_n.shape == (1, B, H)
    assert jnp.allclose(scores, scores_ref, atol=1e-5, rtol=1e-5)
    assert jnp.allclose(h_n, h_ref, atol=1e-5, rtol=1e-5)
    assert jnp.allclose(c_n, c_ref, atol=1e-5, rtol=1e-5)

    # ---- dec_hidden=None path (start-of-decoding case) ----------------------
    scores0, (h0_n, c0_n) = fwd(input_ids, params, None)
    jax.block_until_ready((scores0, h0_n, c0_n))
    scores0_ref, (h0_ref, c0_ref) = reference_forward(input_ids, params, None)
    assert jnp.allclose(scores0, scores0_ref, atol=1e-5, rtol=1e-5)
    assert jnp.allclose(h0_n, h0_ref, atol=1e-5, rtol=1e-5)
    assert jnp.allclose(c0_n, c0_ref, atol=1e-5, rtol=1e-5)

    # ---- bf16 bulk-matmul path (looser tolerance; recurrence stays f32) -----
    scores_bf, (h_bf, c_bf) = fwd(input_ids, params, dec_hidden,
                                  use_bf16_matmul=True)
    jax.block_until_ready((scores_bf, h_bf, c_bf))
    assert jnp.allclose(scores_bf, scores_ref, atol=5e-2, rtol=5e-2)
    assert jnp.allclose(h_bf, h_ref, atol=1e-5, rtol=1e-5)   # state path is f32
    assert jnp.allclose(c_bf, c_ref, atol=1e-5, rtol=1e-5)

    print("KERNEL_OK")
</pallas_src>

<mosaic_0001>
module attributes {stable_mosaic.version = 11 : i64} {
  func.func @_lstm_step_kernel(%arg0: i32, %arg1: memref<1x8x512xf32, #tpu.memory_space<vmem>>, %arg2: memref<8x128xf32, #tpu.memory_space<vmem>>, %arg3: memref<8x128xf32, #tpu.memory_space<vmem>>, %arg4: memref<128x512xf32, #tpu.memory_space<vmem>>, %arg5: memref<1x8x128xf32, #tpu.memory_space<vmem>>, %arg6: memref<8x128xf32, #tpu.memory_space<vmem>>, %arg7: memref<8x128xf32, #tpu.memory_space<vmem>>, %arg8: memref<8x128xf32, #tpu.memory_space<vmem>>, %arg9: memref<8x128xf32, #tpu.memory_space<vmem>>) attributes {dimension_semantics = [#tpu.dimension_semantics<arbitrary>], iteration_bounds = array<i64: 8>, scalar_prefetch = 0 : i64, scratch_operands = 2 : i64, tpu.core_type = #tpu.core_type<tc>, window_params = [{transform_indices = @transform_0, window_bounds = array<i64: 1, 8, 512>}, {pipeline_mode = #tpu.pipeline_mode<synchronous>, transform_indices = @transform_1, window_bounds = array<i64: 8, 128>}, {pipeline_mode = #tpu.pipeline_mode<synchronous>, transform_indices = @transform_2, window_bounds = array<i64: 8, 128>}, {pipeline_mode = #tpu.pipeline_mode<synchronous>, transform_indices = @transform_3, window_bounds = array<i64: 128, 512>}, {transform_indices = @transform_4, window_bounds = array<i64: 1, 8, 128>}, {pipeline_mode = #tpu.pipeline_mode<synchronous>, transform_indices = @transform_5, window_bounds = array<i64: 8, 128>}, {pipeline_mode = #tpu.pipeline_mode<synchronous>, transform_indices = @transform_6, window_bounds = array<i64: 8, 128>}]} {
    %c0_i32 = arith.constant 0 : i32
    %0 = arith.cmpi eq, %arg0, %c0_i32 : i32
    %1 = arith.extui %0 : i1 to i32
    %c0_i32_0 = arith.constant 0 : i32
    %2 = arith.cmpi ne, %1, %c0_i32_0 : i32
    scf.if %2 {
      %c0_20 = arith.constant 0 : index
      %c0_21 = arith.constant 0 : index
      %43 = vector.load %arg2[%c0_20, %c0_21] : memref<8x128xf32, #tpu.memory_space<vmem>>, vector<8x128xf32>
      %c0_22 = arith.constant 0 : index
      %c0_23 = arith.constant 0 : index
      %44 = vector.load %arg8[%c0_22, %c0_23] : memref<8x128xf32, #tpu.memory_space<vmem>>, vector<8x128xf32>
      tpu.vector_store %arg8[%c0_22, %c0_23], %43 {strides = array<i32>} : memref<8x128xf32, #tpu.memory_space<vmem>>, vector<8x128xf32>,
      %c0_24 = arith.constant 0 : index
      %c0_25 = arith.constant 0 : index
      %45 = vector.load %arg3[%c0_24, %c0_25] : memref<8x128xf32, #tpu.memory_space<vmem>>, vector<8x128xf32>
      %c0_26 = arith.constant 0 : index
      %c0_27 = arith.constant 0 : index
      %46 = vector.load %arg9[%c0_26, %c0_27] : memref<8x128xf32, #tpu.memory_space<vmem>>, vector<8x128xf32>
      tpu.vector_store %arg9[%c0_26, %c0_27], %45 {strides = array<i32>} : memref<8x128xf32, #tpu.memory_space<vmem>>, vector<8x128xf32>,
    } else {
    }
    %c0 = arith.constant 0 : index
    %c0_1 = arith.constant 0 : index
    %3 = vector.load %arg8[%c0, %c0_1] : memref<8x128xf32, #tpu.memory_space<vmem>>, vector<8x128xf32>
    %c0_2 = arith.constant 0 : index
    %c0_3 = arith.constant 0 : index
    %4 = vector.load %arg9[%c0_2, %c0_3] : memref<8x128xf32, #tpu.memory_space<vmem>>, vector<8x128xf32>
    %c0_4 = arith.constant 0 : index
    %c0_5 = arith.constant 0 : index
    %c0_6 = arith.constant 0 : index
    %5 = vector.load %arg1[%c0_4, %c0_5, %c0_6] : memref<1x8x512xf32, #tpu.memory_space<vmem>>, vector<1x8x512xf32>
    %6 = vector.shape_cast %5 : vector<1x8x512xf32> to vector<8x512xf32>
    %c0_7 = arith.constant 0 : index
    %c0_8 = arith.constant 0 : index
    %7 = vector.load %arg4[%c0_7, %c0_8] : memref<128x512xf32, #tpu.memory_space<vmem>>, vector<128x512xf32>
    %cst = arith.constant dense<0.000000e+00> : vector<8x512xf32>
    %8 = tpu.matmul %3, %7, %cst {dimension_numbers = #tpu.dot_dimension_numbers<[1], [0], [0], [1], [0, 0, 1, 1], [], []>} : vector<8x128xf32>, vector<128x512xf32>, vector<8x512xf32> -> vector<8x512xf32>
    %9 = arith.addf %6, %8 : vector<8x512xf32>
    %10 = vector.extract_strided_slice %9 {offsets = [0, 0], sizes = [8, 128], strides = [1, 1]} : vector<8x512xf32> to vector<8x128xf32>
    %11 = arith.negf %10 : vector<8x128xf32>
    %12 = math.exp %11 : vector<8x128xf32>
    %cst_9 = arith.constant 1.000000e+00 : f32
    %13 = vector.broadcast %cst_9 : f32 to vector<8x128xf32>
    %14 = arith.addf %13, %12 : vector<8x128xf32>
    %15 = arith.divf %13, %14 : vector<8x128xf32>
    %16 = vector.extract_strided_slice %9 {offsets = [0, 128], sizes = [8, 128], strides = [1, 1]} : vector<8x512xf32> to vector<8x128xf32>
    %17 = arith.negf %16 : vector<8x128xf32>
    %18 = math.exp %17 : vector<8x128xf32>
    %cst_10 = arith.constant 1.000000e+00 : f32
    %19 = vector.broadcast %cst_10 : f32 to vector<8x128xf32>
    %20 = arith.addf %19, %18 : vector<8x128xf32>
    %21 = arith.divf %19, %20 : vector<8x128xf32>
    %22 = vector.extract_strided_slice %9 {offsets = [0, 256], sizes = [8, 128], strides = [1, 1]} : vector<8x512xf32> to vector<8x128xf32>
    %23 = math.tanh %22 : vector<8x128xf32>
    %24 = vector.extract_strided_slice %9 {offsets = [0, 384], sizes = [8, 128], strides = [1, 1]} : vector<8x512xf32> to vector<8x128xf32>
    %25 = arith.negf %24 : vector<8x128xf32>
    %26 = math.exp %25 : vector<8x128xf32>
    %cst_11 = arith.constant 1.000000e+00 : f32
    %27 = vector.broadcast %cst_11 : f32 to vector<8x128xf32>
    %28 = arith.addf %27, %26 : vector<8x128xf32>
    %29 = arith.divf %27, %28 : vector<8x128xf32>
    %30 = arith.mulf %21, %4 : vector<8x128xf32>
    %31 = arith.mulf %15, %23 : vector<8x128xf32>
    %32 = arith.addf %30, %31 : vector<8x128xf32>
    %33 = math.tanh %32 : vector<8x128xf32>
    %34 = arith.mulf %29, %33 : vector<8x128xf32>
    %c0_12 = arith.constant 0 : index
    %c0_13 = arith.constant 0 : index
    %35 = vector.load %arg8[%c0_12, %c0_13] : memref<8x128xf32, #tpu.memory_space<vmem>>, vector<8x128xf32>
    tpu.vector_store %arg8[%c0_12, %c0_13], %34 {strides = array<i32>} : memref<8x128xf32, #tpu.memory_space<vmem>>, vector<8x128xf32>,
    %c0_14 = arith.constant 0 : index
    %c0_15 = arith.constant 0 : index
    %36 = vector.load %arg9[%c0_14, %c0_15] : memref<8x128xf32, #tpu.memory_space<vmem>>, vector<8x128xf32>
    tpu.vector_store %arg9[%c0_14, %c0_15], %32 {strides = array<i32>} : memref<8x128xf32, #tpu.memory_space<vmem>>, vector<8x128xf32>,
    %c0_16 = arith.constant 0 : index
    %c0_17 = arith.constant 0 : index
    %c0_18 = arith.constant 0 : index
    %37 = vector.load %arg5[%c0_16, %c0_17, %c0_18] : memref<1x8x128xf32, #tpu.memory_space<vmem>>, vector<1x8x128xf32>
    %38 = vector.shape_cast %37 : vector<1x8x128xf32> to vector<8x128xf32>
    %39 = vector.shape_cast %34 : vector<8x128xf32> to vector<1x8x128xf32>
    tpu.vector_store %arg5[%c0_16, %c0_17, %c0_18], %39 {strides = array<i32>} : memref<1x8x128xf32, #tpu.memory_space<vmem>>, vector<1x8x128xf32>,
    %c7_i32 = arith.constant 7 : i32
    %40 = arith.cmpi eq, %arg0, %c7_i32 : i32
    %41 = arith.extui %40 : i1 to i32
    %c0_i32_19 = arith.constant 0 : i32
    %42 = arith.cmpi ne, %41, %c0_i32_19 : i32
    scf.if %42 {
      %c0_20 = arith.constant 0 : index
      %c0_21 = arith.constant 0 : index
      %43 = vector.load %arg6[%c0_20, %c0_21] : memref<8x128xf32, #tpu.memory_space<vmem>>, vector<8x128xf32>
      tpu.vector_store %arg6[%c0_20, %c0_21], %34 {strides = array<i32>} : memref<8x128xf32, #tpu.memory_space<vmem>>, vector<8x128xf32>,
      %c0_22 = arith.constant 0 : index
      %c0_23 = arith.constant 0 : index
      %44 = vector.load %arg7[%c0_22, %c0_23] : memref<8x128xf32, #tpu.memory_space<vmem>>, vector<8x128xf32>
      tpu.vector_store %arg7[%c0_22, %c0_23], %32 {strides = array<i32>} : memref<8x128xf32, #tpu.memory_space<vmem>>, vector<8x128xf32>,
    } else {
    }
    return
  }
  func.func @transform_0(%arg0: i32) -> (i32, i32, i32) {
    %c0_i32 = arith.constant 0 : i32
    %c0_i32_0 = arith.constant 0 : i32
    %c0_i32_1 = arith.constant 0 : i32
    return %arg0, %c0_i32, %c0_i32_0 : i32, i32, i32
  }
  func.func @transform_1(%arg0: i32) -> (i32, i32) {
    %c0_i32 = arith.constant 0 : i32
    %c0_i32_0 = arith.constant 0 : i32
    %c0_i32_1 = arith.constant 0 : i32
    return %c0_i32, %c0_i32_0 : i32, i32
  }
  func.func @transform_2(%arg0: i32) -> (i32, i32) {
    %c0_i32 = arith.constant 0 : i32
    %c0_i32_0 = arith.constant 0 : i32
    %c0_i32_1 = arith.constant 0 : i32
    return %c0_i32, %c0_i32_0 : i32, i32
  }
  func.func @transform_3(%arg0: i32) -> (i32, i32) {
    %c0_i32 = arith.constant 0 : i32
    %c0_i32_0 = arith.constant 0 : i32
    %c0_i32_1 = arith.constant 0 : i32
    return %c0_i32, %c0_i32_0 : i32, i32
  }
  func.func @transform_4(%arg0: i32) -> (i32, i32, i32) {
    %c0_i32 = arith.constant 0 : i32
    %c0_i32_0 = arith.constant 0 : i32
    %c0_i32_1 = arith.constant 0 : i32
    return %arg0, %c0_i32, %c0_i32_0 : i32, i32, i32
  }
  func.func @transform_5(%arg0: i32) -> (i32, i32) {
    %c0_i32 = arith.constant 0 : i32
    %c0_i32_0 = arith.constant 0 : i32
    %c0_i32_1 = arith.constant 0 : i32
    return %c0_i32, %c0_i32_0 : i32, i32
  }
  func.func @transform_6(%arg0: i32) -> (i32, i32) {
    %c0_i32 = arith.constant 0 : i32
    %c0_i32_0 = arith.constant 0 : i32
    %c0_i32_1 = arith.constant 0 : i32
    return %c0_i32, %c0_i32_0 : i32, i32
  }
}

module attributes {stable_mosaic.version = 11 : i64} {
  func.func @_matmul_bias_kernel(%arg0: i32, %arg1: memref<64x128xf32, #tpu.memory_space<vmem>>, %arg2: memref<128x64xf32, #tpu.memory_space<vmem>>, %arg3: memref<1x64xf32, #tpu.memory_space<vmem>>, %arg4: memref<64x64xf32, #tpu.memory_space<vmem>>) attributes {dimension_semantics = [#tpu.dimension_semantics<parallel>], iteration_bounds = array<i64: 1>, scalar_prefetch = 0 : i64, scratch_operands = 0 : i64, tpu.core_type = #tpu.core_type<tc>, window_params = [{transform_indices = @transform_0, window_bounds = array<i64: 64, 128>}, {pipeline_mode = #tpu.pipeline_mode<synchronous>, transform_indices = @transform_1, window_bounds = array<i64: 128, 64>}, {pipeline_mode = #tpu.pipeline_mode<synchronous>, transform_indices = @transform_2, window_bounds = array<i64: 1, 64>}, {transform_indices = @transform_3, window_bounds = array<i64: 64, 64>}]} {
    %c0 = arith.constant 0 : index
    %c0_0 = arith.constant 0 : index
    %0 = vector.load %arg1[%c0, %c0_0] : memref<64x128xf32, #tpu.memory_space<vmem>>, vector<64x128xf32>
    %c0_1 = arith.constant 0 : index
    %c0_2 = arith.constant 0 : index
    %1 = vector.load %arg2[%c0_1, %c0_2] : memref<128x64xf32, #tpu.memory_space<vmem>>, vector<128x64xf32>
    %cst = arith.constant dense<0.000000e+00> : vector<64x64xf32>
    %2 = tpu.matmul %0, %1, %cst {dimension_numbers = #tpu.dot_dimension_numbers<[1], [0], [0], [1], [0, 0, 1, 1], [], []>} : vector<64x128xf32>, vector<128x64xf32>, vector<64x64xf32> -> vector<64x64xf32>
    %c0_3 = arith.constant 0 : index
    %c0_4 = arith.constant 0 : index
    %3 = vector.load %arg3[%c0_3, %c0_4] : memref<1x64xf32, #tpu.memory_space<vmem>>, vector<1x64xf32>
    %4 = vector.broadcast %3 : vector<1x64xf32> to vector<64x64xf32>
    %5 = arith.addf %2, %4 : vector<64x64xf32>
    %c0_5 = arith.constant 0 : index
    %c0_6 = arith.constant 0 : index
    %6 = vector.load %arg4[%c0_5, %c0_6] : memref<64x64xf32, #tpu.memory_space<vmem>>, vector<64x64xf32>
    tpu.vector_store %arg4[%c0_5, %c0_6], %5 {strides = array<i32>} : memref<64x64xf32, #tpu.memory_space<vmem>>, vector<64x64xf32>,
    return
  }
  func.func @transform_0(%arg0: i32) -> (i32, i32) {
    %c0_i32 = arith.constant 0 : i32
    %c0_i32_0 = arith.constant 0 : i32
    return %arg0, %c0_i32 : i32, i32
  }
  func.func @transform_1(%arg0: i32) -> (i32, i32) {
    %c0_i32 = arith.constant 0 : i32
    %c0_i32_0 = arith.constant 0 : i32
    %c0_i32_1 = arith.constant 0 : i32
    return %c0_i32, %c0_i32_0 : i32, i32
  }
  func.func @transform_2(%arg0: i32) -> (i32, i32) {
    %c0_i32 = arith.constant 0 : i32
    %c0_i32_0 = arith.constant 0 : i32
    %c0_i32_1 = arith.constant 0 : i32
    return %c0_i32, %c0_i32_0 : i32, i32
  }
  func.func @transform_3(%arg0: i32) -> (i32, i32) {
    %c0_i32 = arith.constant 0 : i32
    %c0_i32_0 = arith.constant 0 : i32
    return %arg0, %c0_i32 : i32, i32
  }
}

</mosaic_0001>

<bundles_post_ra>
// kernel: char_decoder_forward.2
= control target key start
LH: loop header
LB: loop body
LE: loop exit
PB: predicated region body
PF: predicated region fallthrough
CT: control target
= control target key end

     0   :  { %s652_s21 = smov 0   ;;  %s888_s0 = inlined_call_operand.vmem [shape: f32[8,8,512], index: 0, kind: input, shape index: {}]   ;;  %s889_s1 = inlined_call_operand.vmem [shape: f32[8,128], index: 1, kind: input, shape index: {}]   ;;  %s890_s2 = inlined_call_operand.vmem [shape: f32[8,128], index: 2, kind: input, shape index: {}]   ;;  %s891_s3 = inlined_call_operand.vmem [shape: f32[128,512], index: 3, kind: input, shape index: {}]   ;;  %s892_s4 = inlined_call_operand.vmem [shape: f32[8,8,128], index: 4, kind: output, shape index: {0}]   ;;  %s893_s5 = inlined_call_operand.vmem [shape: f32[8,128], index: 5, kind: output, shape index: {1}]   ;;  %s894_s6 = inlined_call_operand.vmem [shape: f32[8,128], index: 6, kind: output, shape index: {2}]  }
   0x1 LB: > { %s658_s22 = sadd.s32 4294967295, %s614_s21   ;;  %p571_p0 = scmp.ge.s32.totalorder %s614_s21, 1  ;;  %s614_s21 = sphi %s652_s21, %s17_s21  }
   0x2   : > { %p207_p1 = scmp.lt.s32.totalorder %s614_s21, 9 }
   0x4   : > { %p208_p2 = pnand %p571_p0, %p207_p1 }
   0x5   : > { %p236_p3 = scmp.lt.s32.totalorder (!%p208_p2), %s658_s22, 7  ;;  %p575_p4 = scmp.ne.s32.totalorder (!%p208_p2), %s658_s22, 0 }
   0x6   : > { %211 = sbr.rel (%p208_p2) target bundleno = 304 (0x130), region = 36 }
   0xb   : > { %s237_s23 = scalar_select %p236_p3, %s658_s22, 7 }
   0xc   : > { %248 = sbr.rel (%p575_p4) target bundleno = 20 (0x14), region = 40 }
   0xd   : > { %s582_s24 = sshll.u32 %s237_s23, 5  ;;  %s574_s25 = sshll.u32 %s237_s23, 3 }
   0xe   : > { %s667_s28 = scalar_lea.vmem %s888_s0, %s582_s24  ;;  %s672_s7 = scalar_lea.vmem %s892_s4, %s574_s25 }
  0x11   : > { %v249_v0 = vld [vmem:[%s889_s1] sm:$0xff] }
  0x12   : > { %v251_v1 = vld [vmem:[%s890_s2] sm:$0xff]  ;;  %250 = vst [vmem:[#allocation2] sm:$0xff] %v249_v0 }
  0x13   : > { %252 = vst [vmem:[#allocation3] sm:$0xff] %v251_v1 }
  0x14 PF: > { %v320_v2 = vld [vmem:[%s891_s3 + $0x1e8] sm:$0xff]  ;;  %v319_v3 = vld [vmem:[%s891_s3 + $0x1e0] sm:$0xff]  ;;  %v616_v6 = vmov 0.0   ;;  %v322_v11 = vld [vmem:[%s891_s3 + $0x1f8] sm:$0xff]  ;;  %p579_p5 = scmp.ne.s32.totalorder %s658_s22, 7 }
  0x15   : > { %v316_v4 = vld [vmem:[%s891_s3 + $0x1c8] sm:$0xff]  ;;  %323 = vmatprep.subr.mxu0 %v320_v2  ;;  %v315_v5 = vld [vmem:[%s891_s3 + $0x1c0] sm:$0xff]  ;;  %387 = vmatprep.mubr.f32.mxu0 %v616_v6  ;;  %v321_v13 = vld [vmem:[%s891_s3 + $0x1f0] sm:$0xff] }
  0x16   : > { %324 = vmatpush1.msra.mxu0 %v319_v3  ;;  %v312_v7 = vld [vmem:[%s891_s3 + $0x1a8] sm:$0xff]  ;;  %458 = vmatprep.mubr.f32.mxu1 %v616_v6  ;;  %v311_v8 = vld [vmem:[%s891_s3 + $0x1a0] sm:$0xff]  ;;  %v318_v15 = vld [vmem:[%s891_s3 + $0x1d8] sm:$0xff] }
  0x17   : > { %325 = vmatprep.subr.mxu0 %v316_v4  ;;  %v308_v9 = vld [vmem:[%s891_s3 + $0x188] sm:$0xff]  ;;  %v307_v10 = vld [vmem:[%s891_s3 + $0x180] sm:$0xff]  ;;  %394 = vmatprep.subr.mxu1 %v322_v11  ;;  %v317_v16 = vld [vmem:[%s891_s3 + $0x1d0] sm:$0xff] }
  0x18   : > { %326 = vmatpush1.msra.mxu0 %v315_v5  ;;  %v304_v12 = vld [vmem:[%s891_s3 + $0x168] sm:$0xff]  ;;  %v303_v14 = vld [vmem:[%s891_s3 + $0x160] sm:$0xff]  ;;  %395 = vmatpush1.msra.mxu1 %v321_v13  ;;  %v314_v18 = vld [vmem:[%s891_s3 + $0x1b8] sm:$0xff] }
  0x19   : > { %327 = vmatprep.subr.mxu0 %v312_v7  ;;  %v300_v17 = vld [vmem:[%s891_s3 + $0x148] sm:$0xff]  ;;  %396 = vmatprep.subr.mxu1 %v318_v15  ;;  %v299_v19 = vld [vmem:[%s891_s3 + $0x140] sm:$0xff]  ;;  %v313_v20 = vld [vmem:[%s891_s3 + $0x1b0] sm:$0xff] }
  0x1a   : > { %328 = vmatpush1.msra.mxu0 %v311_v8  ;;  %397 = vmatpush1.msra.mxu1 %v317_v16  ;;  %v310_v21 = vld [vmem:[%s891_s3 + $0x198] sm:$0xff]  ;;  %v296_v22 = vld [vmem:[%s891_s3 + $0x128] sm:$0xff]  ;;  %v309_v23 = vld [vmem:[%s891_s3 + $0x190] sm:$0xff] }
  0x1b   : > { %329 = vmatprep.subr.mxu0 %v308_v9  ;;  %398 = vmatprep.subr.mxu1 %v314_v18  ;;  %v295_v24 = vld [vmem:[%s891_s3 + $0x120] sm:$0xff]  ;;  %v306_v25 = vld [vmem:[%s891_s3 + $0x178] sm:$0xff]  ;;  %v292_v26 = vld [vmem:[%s891_s3 + $0x108] sm:$0xff] }
  0x1c   : > { %330 = vmatpush1.msra.mxu0 %v307_v10  ;;  %399 = vmatpush1.msra.mxu1 %v313_v20  ;;  %v305_v27 = vld [vmem:[%s891_s3 + $0x170] sm:$0xff]  ;;  %v291_v28 = vld [vmem:[%s891_s3 + $0x100] sm:$0xff]  ;;  %v302_v29 = vld [vmem:[%s891_s3 + $0x158] sm:$0xff] }
  0x1d   : > { %331 = vmatprep.subr.mxu0 %v304_v12  ;;  %400 = vmatprep.subr.mxu1 %v310_v21  ;;  %v288_v30 = vld [vmem:[%s891_s3 + $0xe8] sm:$0xff]  ;;  %v301_v31 = vld [vmem:[%s891_s3 + $0x150] sm:$0xff]  ;;  %v287_v32 = vld [vmem:[%s891_s3 + $0xe0] sm:$0xff] }
  0x1e   : > { %332 = vmatpush1.msra.mxu0 %v303_v14  ;;  %401 = vmatpush1.msra.mxu1 %v309_v23  ;;  %v298_v33 = vld [vmem:[%s891_s3 + $0x138] sm:$0xff]  ;;  %v284_v34 = vld [vmem:[%s891_s3 + $0xc8] sm:$0xff]  ;;  %v297_v35 = vld [vmem:[%s891_s3 + $0x130] sm:$0xff] }
  0x1f   : > { %333 = vmatprep.subr.mxu0 %v300_v17  ;;  %402 = vmatprep.subr.mxu1 %v306_v25  ;;  %v283_v36 = vld [vmem:[%s891_s3 + $0xc0] sm:$0xff]  ;;  %v294_v37 = vld [vmem:[%s891_s3 + $0x118] sm:$0xff]  ;;  %v280_v38 = vld [vmem:[%s891_s3 + $0xa8] sm:$0xff] }
  0x20   : > { %334 = vmatpush1.msra.mxu0 %v299_v19  ;;  %403 = vmatpush1.msra.mxu1 %v305_v27  ;;  %v293_v39 = vld [vmem:[%s891_s3 + $0x110] sm:$0xff]  ;;  %v279_v40 = vld [vmem:[%s891_s3 + $0xa0] sm:$0xff]  ;;  %v290_v41 = vld [vmem:[%s891_s3 + $0xf8] sm:$0xff] }
  0x21   : > { %335 = vmatprep.subr.mxu0 %v296_v22  ;;  %404 = vmatprep.subr.mxu1 %v302_v29  ;;  %v276_v42 = vld [vmem:[%s891_s3 + $0x88] sm:$0xff]  ;;  %v289_v43 = vld [vmem:[%s891_s3 + $0xf0] sm:$0xff]  ;;  %v275_v44 = vld [vmem:[%s891_s3 + $0x80] sm:$0xff] }
  0x22   : > { %336 = vmatpush1.msra.mxu0 %v295_v24  ;;  %405 = vmatpush1.msra.mxu1 %v301_v31  ;;  %v286_v45 = vld [vmem:[%s891_s3 + $0xd8] sm:$0xff]  ;;  %v272_v46 = vld [vmem:[%s891_s3 + $0x68] sm:$0xff]  ;;  %v285_v47 = vld [vmem:[%s891_s3 + $0xd0] sm:$0xff] }
  0x23   : > { %337 = vmatprep.subr.mxu0 %v292_v26  ;;  %406 = vmatprep.subr.mxu1 %v298_v33  ;;  %v271_v48 = vld [vmem:[%s891_s3 + $0x60] sm:$0xff]  ;;  %v282_v49 = vld [vmem:[%s891_s3 + $0xb8] sm:$0xff]  ;;  %v268_v50 = vld [vmem:[%s891_s3 + $0x48] sm:$0xff] }
  0x24   : > { %338 = vmatpush1.msra.mxu0 %v291_v28  ;;  %407 = vmatpush1.msra.mxu1 %v297_v35  ;;  %v281_v51 = vld [vmem:[%s891_s3 + $0xb0] sm:$0xff]  ;;  %v267_v52 = vld [vmem:[%s891_s3 + $0x40] sm:$0xff]  ;;  %v278_v53 = vld [vmem:[%s891_s3 + $0x98] sm:$0xff] }
  0x25   : > { %339 = vmatprep.subr.mxu0 %v288_v30  ;;  %408 = vmatprep.subr.mxu1 %v294_v37  ;;  %v264_v54 = vld [vmem:[%s891_s3 + $0x28] sm:$0xff]  ;;  %v277_v55 = vld [vmem:[%s891_s3 + $0x90] sm:$0xff]  ;;  %v263_v56 = vld [vmem:[%s891_s3 + $0x20] sm:$0xff] }
  0x26   : > { %340 = vmatpush1.msra.mxu0 %v287_v32  ;;  %409 = vmatpush1.msra.mxu1 %v293_v39  ;;  %v274_v57 = vld [vmem:[%s891_s3 + $0x78] sm:$0xff]  ;;  %v260_v58 = vld [vmem:[%s891_s3 + $0x8] sm:$0xff]  ;;  %v273_v59 = vld [vmem:[%s891_s3 + $0x70] sm:$0xff] }
  0x27   : > { %341 = vmatprep.subr.mxu0 %v284_v34  ;;  %410 = vmatprep.subr.mxu1 %v290_v41  ;;  %v259_v60 = vld [vmem:[%s891_s3] sm:$0xff]  ;;  %v270_v61 = vld [vmem:[%s891_s3 + $0x58] sm:$0xff]  ;;  %v269_v63 = vld [vmem:[%s891_s3 + $0x50] sm:$0xff] }
  0x28   : > { %342 = vmatpush1.msra.mxu0 %v283_v36  ;;  %411 = vmatpush1.msra.mxu1 %v289_v43  ;;  %v253_v62 = vld [vmem:[#allocation2] sm:$0xff]  ;;  %v266_v0 = vld [vmem:[%s891_s3 + $0x38] sm:$0xff]  ;;  %v265_v1 = vld [vmem:[%s891_s3 + $0x30] sm:$0xff] }
  0x29   : > { %343 = vmatprep.subr.mxu0 %v280_v38  ;;  %412 = vmatprep.subr.mxu1 %v286_v45  ;;  %v262_v2 = vld [vmem:[%s891_s3 + $0x18] sm:$0xff]  ;;  %v261_v3 = vld [vmem:[%s891_s3 + $0x10] sm:$0xff]  ;;  %v255_v4 = vld [vmem:[%s667_s28] sm:$0xff] }
  0x2a   : > { %344 = vmatpush1.msra.mxu0 %v279_v40  ;;  %413 = vmatpush1.msra.mxu1 %v285_v47  ;;  %v256_v6 = vld [vmem:[%s667_s28 + $0x8] sm:$0xff]  ;;  %v258_v13 = vld [vmem:[%s667_s28 + $0x18] sm:$0xff]  ;;  %v257_v15 = vld [vmem:[%s667_s28 + $0x10] sm:$0xff] }
  0x2b   : > { %345 = vmatprep.subr.mxu0 %v276_v42  ;;  %414 = vmatprep.subr.mxu1 %v282_v49  ;;  %v254_v26 = vld [vmem:[#allocation3] sm:$0xff] }
  0x2c   : > { %346 = vmatpush1.msra.mxu0 %v275_v44  ;;  %415 = vmatpush1.msra.mxu1 %v281_v51 }
  0x2d   : > { %347 = vmatprep.subr.mxu0 %v272_v46  ;;  %416 = vmatprep.subr.mxu1 %v278_v53 }
  0x2e   : > { %348 = vmatpush1.msra.mxu0 %v271_v48  ;;  %417 = vmatpush1.msra.mxu1 %v277_v55 }
  0x2f   : > { %349 = vmatprep.subr.mxu0 %v268_v50  ;;  %418 = vmatprep.subr.mxu1 %v274_v57 }
  0x30   : > { %350 = vmatpush1.msra.mxu0 %v267_v52  ;;  %419 = vmatpush1.msra.mxu1 %v273_v59 }
  0x31   : > { %351 = vmatprep.subr.mxu0 %v264_v54  ;;  %420 = vmatprep.subr.mxu1 %v270_v61 }
  0x32   : > { %352 = vmatpush1.msra.mxu0 %v263_v56  ;;  %421 = vmatpush1.msra.mxu1 %v269_v63 }
  0x33   : > { %353 = vmatprep.subr.mxu0 %v260_v58  ;;  %422 = vmatprep.subr.mxu1 %v266_v0 }
  0x34   : > { %354 = vmatpush1.msra.mxu0 %v259_v60  ;;  %423 = vmatpush1.msra.mxu1 %v265_v1 }
  0x35   : > { %388 = vmatmul.mubr.f32.vlgmr.msra.gmra.mxu0 %v253_v62  ;;  %424 = vmatprep.subr.mxu1 %v262_v2 }
  0x36   : > { %425 = vmatpush1.msra.mxu1 %v261_v3 }
  0x37   : > { %459 = vmatmul.mubr.f32.vlgmr.msra.gmra.mxu1 %v253_v62 }
  0xf5   : > { %v389_v5 = vpop.f32.mrf.mxu0 }
  0xf6   : > { %v465_v7 = vadd.f32 %v389_v5, %v255_v4 }
  0xf7   : > { %v391_v8 = vpop.f32.mrf.mxu0  ;;  %v460_v12 = vpop.f32.mrf.mxu1 }
  0xf8   : > { %v576_v9 = vmul.f32 -1.442695, %v465_v7  ;;  %v466_v10 = vadd.f32 %v391_v8, %v256_v6  ;;  %v467_v17 = vadd.f32 %v460_v12, %v257_v15 }
  0xf9   : > { %v462_v14 = vpop.f32.mrf.mxu1 }
  0xfa   : > { %592 = vpow2.f32 %v576_v9  ;;  %v577_v11 = vmul.f32 -1.442695, %v466_v10  ;;  %v468_v16 = vadd.f32 %v462_v14, %v258_v13 }
  0xfc   : > { %594 = vpow2.f32 %v577_v11  ;;  %v578_v18 = vmul.f32 -1.442695, %v468_v16 }
  0xfd   : > { %596 = vtanh.f32 %v467_v17 }
  0xfe   : > { %598 = vpow2.f32 %v578_v18 }
 0x107   : > { %v593_v19 = vpop.eup %592 }
 0x108   : > { %v472_v20 = vadd.f32 1.0, %v593_v19 }
 0x109   : > { %v595_v21 = vpop.eup %594 }
 0x10a   : > { %600 = vrcp.f32 %v472_v20  ;;  %v478_v22 = vadd.f32 1.0, %v595_v21  ;;  %v597_v23 = vpop.eup %596 }
 0x10b   : > { %v599_v24 = vpop.eup %598 }
 0x10c   : > { %602 = vrcp.f32 %v478_v22  ;;  %v485_v28 = vadd.f32 1.0, %v599_v24 }
 0x10e   : > { %604 = vrcp.f32 %v485_v28 }
 0x117   : > { %v601_v25 = vpop.eup %600 }
 0x118   : > { %v489_v30 = vmul.f32 %v601_v25, %v597_v23 }
 0x119   : > { %v603_v27 = vpop.eup %602 }
 0x11a   : > { %v488_v29 = vmul.f32 %v603_v27, %v254_v26 }
 0x11b   : > { %v605_v32 = vpop.eup %604 }
 0x11c   : > { %v490_v31 = vadd.f32 %v489_v30, %v488_v29 }
 0x11e   : > { %606 = vtanh.f32 %v490_v31  ;;  %494 = vst [vmem:[#allocation3] sm:$0xff] %v490_v31 }
 0x12a   : > { %499 = sbr.rel (%p579_p5) target bundleno = 304 (0x130), region = 44 }
 0x12b   : > { %v607_v33 = vpop.eup %606 }
 0x12c   : > { %v492_v34 = vmul.f32 %v607_v33, %v605_v32 }
 0x12e   : > { %493 = vst [vmem:[#allocation2] sm:$0xff] %v492_v34  ;;  %495 = vst [vmem:[%s672_s7] sm:$0xff] %v492_v34 }
 0x12f   : > { %500 = vst [vmem:[%s893_s5] sm:$0xff] %v492_v34  ;;  %501 = vst [vmem:[%s894_s6] sm:$0xff] %v490_v31 }
 0x130 PF: > { %s17_s21 = sadd.s32 1, %s614_s21  }
 0x131   : > { %p14_p6 = scmp.ge.s32.totalorder %s17_s21, 10  }
 0x133   :  { %16 = sbr.rel (!%p14_p6) target bundleno = 1 (0x1), region = 90 }

// kernel: char_decoder_forward.3
= control target key start
LH: loop header
LB: loop body
LE: loop exit
PB: predicated region body
PF: predicated region fallthrough
CT: control target
= control target key end

     0   :  { %vm150_vm0 = vcmask 523264   ;;  %s391_s1 = inlined_call_operand.vmem [shape: f32[128,64], index: 1, kind: input, shape index: {}]   ;;  %s392_s0 = inlined_call_operand.vmem [shape: f32[64,128], index: 0, kind: input, shape index: {}]   ;;  %s393_s2 = inlined_call_operand.vmem [shape: f32[1,64], index: 2, kind: input, shape index: {}]   ;;  %s394_s3 = inlined_call_operand.vmem [shape: f32[64,64], index: 3, kind: output, shape index: {}]  }
   0x1   :  { %v37_v0 = vld [vmem:[%s391_s1 + $0x78] sm:$0xff]  ;;  %v36_v1 = vld [vmem:[%s391_s1 + $0x70] sm:$0xff]  ;;  %v35_v2 = vld [vmem:[%s391_s1 + $0x68] sm:$0xff] }
   0x2   :  { %188 = vmatprep.subr.mxu0 %v37_v0  ;;  %232 = vmatprep.subr.mxu1 %v37_v0  ;;  %v34_v3 = vld [vmem:[%s391_s1 + $0x60] sm:$0xff]  ;;  %v33_v4 = vld [vmem:[%s391_s1 + $0x58] sm:$0xff]  ;;  %v32_v5 = vld [vmem:[%s391_s1 + $0x50] sm:$0xff] }
   0x3   :  { %189 = vmatpush3.msra.mxu0 %v37_v0  ;;  %248 = vmatpush3.msra.mxu1 %v37_v0  ;;  %v31_v6 = vld [vmem:[%s391_s1 + $0x48] sm:$0xff]  ;;  %v30_v7 = vld [vmem:[%s391_s1 + $0x40] sm:$0xff]  ;;  %v29_v8 = vld [vmem:[%s391_s1 + $0x38] sm:$0xff] }
   0x4   :  { %190 = vmatprep.subr.mxu0 %v36_v1  ;;  %233 = vmatprep.subr.mxu1 %v36_v1  ;;  %v28_v9 = vld [vmem:[%s391_s1 + $0x30] sm:$0xff]  ;;  %v27_v10 = vld [vmem:[%s391_s1 + $0x28] sm:$0xff]  ;;  %v26_v11 = vld [vmem:[%s391_s1 + $0x20] sm:$0xff] }
   0x5   :  { %191 = vmatpush3.msra.mxu0 %v36_v1  ;;  %249 = vmatpush3.msra.mxu1 %v36_v1  ;;  %v25_v12 = vld [vmem:[%s391_s1 + $0x18] sm:$0xff]  ;;  %v24_v13 = vld [vmem:[%s391_s1 + $0x10] sm:$0xff]  ;;  %v23_v14 = vld [vmem:[%s391_s1 + $0x8] sm:$0xff] }
   0x6   :  { %192 = vmatprep.subr.mxu0 %v35_v2  ;;  %234 = vmatprep.subr.mxu1 %v35_v2  ;;  %v22_v15 = vld [vmem:[%s391_s1] sm:$0xff]  ;;  %v15_v18 = vld [vmem:[%s392_s0 + $0x8] sm:$0xff]  ;;  %v16_v20 = vld [vmem:[%s392_s0 + $0x10] sm:$0xff] }
   0x7   :  { %193 = vmatpush3.msra.mxu0 %v35_v2  ;;  %250 = vmatpush3.msra.mxu1 %v35_v2  ;;  %v14_v16 = vld [vmem:[%s392_s0] sm:$0xff]  ;;  %v19_v19 = vld [vmem:[%s392_s0 + $0x28] sm:$0xff]  ;;  %v20_v21 = vld [vmem:[%s392_s0 + $0x30] sm:$0xff] }
   0x8   :  { %194 = vmatprep.subr.mxu0 %v34_v3  ;;  %235 = vmatprep.subr.mxu1 %v34_v3  ;;  %v18_v17 = vld [vmem:[%s392_s0 + $0x20] sm:$0xff]  ;;  %v17_v22 = vld [vmem:[%s392_s0 + $0x18] sm:$0xff] }
   0x9   :  { %195 = vmatpush3.msra.mxu0 %v34_v3  ;;  %251 = vmatpush3.msra.mxu1 %v34_v3  ;;  %v21_v23 = vld [vmem:[%s392_s0 + $0x38] sm:$0xff]  ;;  %v163_v24 = vld [vmem:[%s393_s2] ss:$0 sm:$0xff] }
   0xa   :  { %196 = vmatprep.subr.mxu0 %v33_v4  ;;  %236 = vmatprep.subr.mxu1 %v33_v4 }
   0xb   :  { %197 = vmatpush3.msra.mxu0 %v33_v4  ;;  %252 = vmatpush3.msra.mxu1 %v33_v4 }
   0xc   :  { %198 = vmatprep.subr.mxu0 %v32_v5  ;;  %237 = vmatprep.subr.mxu1 %v32_v5 }
   0xd   :  { %199 = vmatpush3.msra.mxu0 %v32_v5  ;;  %253 = vmatpush3.msra.mxu1 %v32_v5 }
   0xe   :  { %200 = vmatprep.subr.mxu0 %v31_v6  ;;  %238 = vmatprep.subr.mxu1 %v31_v6 }
   0xf   :  { %201 = vmatpush3.msra.mxu0 %v31_v6  ;;  %254 = vmatpush3.msra.mxu1 %v31_v6 }
  0x10   :  { %202 = vmatprep.subr.mxu0 %v30_v7  ;;  %239 = vmatprep.subr.mxu1 %v30_v7 }
  0x11   :  { %203 = vmatpush3.msra.mxu0 %v30_v7  ;;  %255 = vmatpush3.msra.mxu1 %v30_v7 }
  0x12   :  { %204 = vmatprep.subr.mxu0 %v29_v8  ;;  %240 = vmatprep.subr.mxu1 %v29_v8 }
  0x13   :  { %205 = vmatpush3.msra.mxu0 %v29_v8  ;;  %256 = vmatpush3.msra.mxu1 %v29_v8 }
  0x14   :  { %206 = vmatprep.subr.mxu0 %v28_v9  ;;  %241 = vmatprep.subr.mxu1 %v28_v9 }
  0x15   :  { %207 = vmatpush3.msra.mxu0 %v28_v9  ;;  %257 = vmatpush3.msra.mxu1 %v28_v9 }
  0x16   :  { %208 = vmatprep.subr.mxu0 %v27_v10  ;;  %242 = vmatprep.subr.mxu1 %v27_v10 }
  0x17   :  { %209 = vmatpush3.msra.mxu0 %v27_v10  ;;  %258 = vmatpush3.msra.mxu1 %v27_v10 }
  0x18   :  { %210 = vmatprep.subr.mxu0 %v26_v11  ;;  %243 = vmatprep.subr.mxu1 %v26_v11 }
  0x19   :  { %211 = vmatpush3.msra.mxu0 %v26_v11  ;;  %259 = vmatpush3.msra.mxu1 %v26_v11 }
  0x1a   :  { %212 = vmatprep.subr.mxu0 %v25_v12  ;;  %244 = vmatprep.subr.mxu1 %v25_v12 }
  0x1b   :  { %213 = vmatpush3.msra.mxu0 %v25_v12  ;;  %260 = vmatpush3.msra.mxu1 %v25_v12 }
  0x1c   :  { %214 = vmatprep.subr.mxu0 %v24_v13  ;;  %245 = vmatprep.subr.mxu1 %v24_v13 }
  0x1d   :  { %215 = vmatpush3.msra.mxu0 %v24_v13  ;;  %261 = vmatpush3.msra.mxu1 %v24_v13 }
  0x1e   :  { %216 = vmatprep.subr.mxu0 %v23_v14  ;;  %246 = vmatprep.subr.mxu1 %v23_v14 }
  0x1f   :  { %217 = vmatpush3.msra.mxu0 %v23_v14  ;;  %262 = vmatpush3.msra.mxu1 %v23_v14 }
  0x20   :  { %218 = vmatprep.subr.mxu0 %v22_v15  ;;  %247 = vmatprep.subr.mxu1 %v22_v15 }
  0x21   :  { %219 = vmatpush3.msra.mxu0 %v22_v15  ;;  %263 = vmatpush3.msra.mxu1 %v22_v15 }
  0x22   :  { %220 = vmatprep.mubr.f32.mxu0 %v14_v16  ;;  %226 = vmatprep.mubr.f32.mxu1 %v18_v17 }
  0x23   :  { %221 = vmatmul.mubr.f32.vlgmr.msra.gmra.mxu0 %v15_v18  ;;  %227 = vmatmul.mubr.f32.vlgmr.msra.gmra.mxu1 %v19_v19 }
  0x24   :  { %223 = vmatprep.mubr.f32.mxu0 %v16_v20  ;;  %229 = vmatprep.mubr.f32.mxu1 %v20_v21 }
  0x27   :  { %224 = vmatmul.mubr.f32.gmra.mxu0 %v17_v22  ;;  %230 = vmatmul.mubr.f32.gmra.mxu1 %v21_v23 }
  0xe3   :  { %v222_v25 = vpop.f32.mrf.mxu0  ;;  %v228_v26 = vpop.f32.mrf.mxu1 }
  0xe4   :  { %v117_v27 = vadd.f32 %v222_v25, %v163_v24  ;;  %v137_v28 = vadd.f32 %v228_v26, %v163_v24 }
  0xe5   :  { %v111_v29 = vpop.f32.mrf.mxu0  ;;  %v131_v30 = vpop.f32.mrf.mxu1 }
  0xe6   :  { %152 = vst.msk [vmem:[%s394_s3 + $0x8] sm:$0xff] %vm150_vm0, %v117_v27  ;;  %156 = vst.msk [vmem:[%s394_s3 + $0x28] sm:$0xff] %vm150_vm0, %v137_v28  ;;  %v112_v31 = vadd.f32 %v163_v24, %v111_v29  ;;  %v132_v32 = vadd.f32 %v163_v24, %v131_v30 }
  0xe7   :  { %v225_v33 = vpop.f32.mrf.mxu0  ;;  %v231_v34 = vpop.f32.mrf.mxu1 }
  0xe8   :  { %151 = vst.msk [vmem:[%s394_s3] sm:$0xff] %vm150_vm0, %v112_v31  ;;  %155 = vst.msk [vmem:[%s394_s3 + $0x20] sm:$0xff] %vm150_vm0, %v132_v32  ;;  %v127_v35 = vadd.f32 %v225_v33, %v163_v24  ;;  %v147_v36 = vadd.f32 %v231_v34, %v163_v24 }
  0xe9   :  { %v121_v37 = vpop.f32.mrf.mxu0  ;;  %v141_v38 = vpop.f32.mrf.mxu1 }
  0xea   :  { %154 = vst.msk [vmem:[%s394_s3 + $0x18] sm:$0xff] %vm150_vm0, %v127_v35  ;;  %158 = vst.msk [vmem:[%s394_s3 + $0x38] sm:$0xff] %vm150_vm0, %v147_v36  ;;  %v122_v39 = vadd.f32 %v163_v24, %v121_v37  ;;  %v142_v40 = vadd.f32 %v163_v24, %v141_v38 }
  0xec   :  { %153 = vst.msk [vmem:[%s394_s3 + $0x10] sm:$0xff] %vm150_vm0, %v122_v39  ;;  %157 = vst.msk [vmem:[%s394_s3 + $0x30] sm:$0xff] %vm150_vm0, %v142_v40 }

</bundles_post_ra>
